<compile_context>
chip_gen: v5e
topology: v5e:2x2
jax: 0.10.0
libtpu: 0.0.40
codegen_flags: <defaults>
</compile_context>

<pallas_src>
import jax
import jax.numpy as jnp
from jax.experimental import pallas as pl
from jax.experimental.pallas import tpu as pltpu


def _make_pos_embed_dma_kernel(seq_len: int, num_chunks: int, chunk_rows: int):
    """Kernel factory: each grid step issues one HBM->HBM DMA of table rows.

    table_hbm : pl.ANY (max_len, hidden)  -- raw embedding table in HBM
    out_hbm   : pl.ANY (seq_len, hidden)  -- raw output in HBM
    sem       : DMA semaphore scratch
    """

    def kernel(table_hbm, out_hbm, sem):
        if num_chunks == 1:
            # Single contiguous DMA: rows [0, seq_len) of the table -> output.
            src = table_hbm.at[pl.ds(0, seq_len), :]
            dst = out_hbm
        else:
            # One sublane-aligned chunk per grid step (disjoint output regions,
            # so the "parallel" grid axis is safe and lets both v7x TCs copy).
            start = pl.multiple_of(pl.program_id(0) * chunk_rows, 8)
            src = table_hbm.at[pl.ds(start, chunk_rows), :]
            dst = out_hbm.at[pl.ds(start, chunk_rows), :]
        cp = pltpu.make_async_copy(src, dst, sem)
        cp.start()
        cp.wait()

    return kernel


def positional_embeddings_forward(input_ids: jax.Array,
                                  embedding_table: jax.Array) -> jax.Array:
    """Pallas equivalent of PositionalEmbeddings.forward.

    input_ids       : (B, S) integer array (only its seq length is used)
    embedding_table : (num_embeddings, hidden)
    returns         : (1, S, hidden), == embedding_table[:S][None]
    """
    seq_len = input_ids.shape[1]
    max_len, hidden = embedding_table.shape
    assert seq_len <= max_len, "sequence longer than embedding table"

    # Full-table request: zero data movement, just add the batch dim.
    if seq_len == max_len:
        return embedding_table[None, :, :]

    # Split into 2 chunks (one per v7x TensorCore) only when the chunk start /
    # size stays sublane-aligned (multiple of 8 rows). Otherwise a single DMA
    # already saturates HBM bandwidth for this copy.
    if seq_len >= 16 and seq_len % 16 == 0:
        num_chunks = 2
    else:
        num_chunks = 1
    chunk_rows = seq_len // num_chunks

    itemsize = jnp.dtype(embedding_table.dtype).itemsize
    cost = pl.CostEstimate(
        flops=0,
        transcendentals=0,
        bytes_accessed=2 * seq_len * hidden * itemsize,  # read + write S rows
    )

    out_2d = pl.pallas_call(
        _make_pos_embed_dma_kernel(seq_len, num_chunks, chunk_rows),
        out_shape=jax.ShapeDtypeStruct((seq_len, hidden), embedding_table.dtype),
        grid=(num_chunks,),
        in_specs=[pl.BlockSpec(memory_space=pl.ANY)],   # raw HBM ref, no auto-DMA
        out_specs=pl.BlockSpec(memory_space=pl.ANY),    # raw HBM ref, written by DMA
        scratch_shapes=[pltpu.SemaphoreType.DMA],
        compiler_params=pltpu.CompilerParams(
            dimension_semantics=("parallel",)),
        cost_estimate=cost,
    )(embedding_table)

    # Add the broadcast batch dim (1, S, H) outside the kernel (free reshape).
    return out_2d[None, :, :]


if __name__ == "__main__":
    # config['tokenizer']['max_length'] = 16, config['model']['hidden_size'] = 32
    max_length = 16
    hidden_size = 32
    batch = 2
    seq = 8

    key = jax.random.PRNGKey(0)
    k_tab, k_ids, k_tab2 = jax.random.split(key, 3)

    # nn.Embedding default init ~ N(0, 1); deterministic here via PRNGKey(0).
    embedding_table = jax.random.normal(k_tab, (max_length, hidden_size),
                                        dtype=jnp.float32)
    # Token values are irrelevant to the forward pass; only seq length matters.
    input_ids = jax.random.randint(k_ids, (batch, seq), 0, 100, dtype=jnp.int32)

    out = positional_embeddings_forward(input_ids, embedding_table)
    out = jax.block_until_ready(out)

    expected = embedding_table[:seq][None, :, :]
    assert out.shape == (1, seq, hidden_size), out.shape
    assert jnp.array_equal(out, expected), "mismatch vs reference (1-chunk path)"

    # Also exercise the sublane-aligned 2-chunk (dual-TC on v7x) path.
    max_length2, hidden2, seq2 = 64, 128, 32
    table2 = jax.random.normal(k_tab2, (max_length2, hidden2), dtype=jnp.float32)
    ids2 = jnp.zeros((batch, seq2), dtype=jnp.int32)
    out2 = jax.block_until_ready(positional_embeddings_forward(ids2, table2))
    assert out2.shape == (1, seq2, hidden2), out2.shape
    assert jnp.array_equal(out2, table2[:seq2][None, :, :]), \
        "mismatch vs reference (2-chunk path)"

    print("KERNEL_OK")
</pallas_src>

<mosaic_0001>
module attributes {stable_mosaic.version = 11 : i64} {
  func.func @kernel(%arg0: i32, %arg1: memref<16x32xf32, #tpu.memory_space<any>>, %arg2: memref<8x32xf32, #tpu.memory_space<any>>, %arg3: memref<!tpu.dma_semaphore, #tpu.memory_space<semaphore_mem>>) attributes {dimension_semantics = [#tpu.dimension_semantics<parallel>], iteration_bounds = array<i64: 1>, scalar_prefetch = 0 : i64, scratch_operands = 1 : i64, tpu.core_type = #tpu.core_type<tc>, window_params = [{}, {}]} {
    %c0_i32 = arith.constant 0 : i32
    %c0_i32_0 = arith.constant 0 : i32
    %0 = tpu.memref_slice %arg1[%c0_i32, %c0_i32_0] : memref<16x32xf32, #tpu.memory_space<any>> -> memref<8x32xf32, #tpu.memory_space<any>>
    tpu.enqueue_dma source(%0 : memref<8x32xf32, #tpu.memory_space<any>>) target(%arg2 : memref<8x32xf32, #tpu.memory_space<any>>) target_semaphore(%arg3 : memref<!tpu.dma_semaphore, #tpu.memory_space<semaphore_mem>>)
    %c0_i32_1 = arith.constant 0 : i32
    %c0_i32_2 = arith.constant 0 : i32
    %1 = tpu.memref_slice %arg1[%c0_i32_1, %c0_i32_2] : memref<16x32xf32, #tpu.memory_space<any>> -> memref<8x32xf32, #tpu.memory_space<any>>
    tpu.wait_dma2 semaphore(%arg3 : memref<!tpu.dma_semaphore, #tpu.memory_space<semaphore_mem>>) src(%1 : memref<8x32xf32, #tpu.memory_space<any>>) dst(%arg2 : memref<8x32xf32, #tpu.memory_space<any>>)
    return
  }
}

</mosaic_0001>

<bundles_post_ra>
// kernel: tpu_custom_call.1
= control target key start
LH: loop header
LB: loop body
LE: loop exit
PB: predicated region body
PF: predicated region fallthrough
CT: control target
= control target key end

     0   :  { %s32_s12 = smov [#allocation2]   ;;  %s33_s13 = smov [#allocation3]   ;;  %s51_s0 = inlined_call_operand.hbm [shape: f32[16,32], index: 0, kind: input, shape index: {}]   ;;  %s52_s1 = inlined_call_operand.hbm [shape: f32[8,32], index: 1, kind: output, shape index: {}]  }
   0x1   :  { %s10_s8 = sshll.u32 %s51_s0, 4  ;;  %s12_s11 = sshll.u32 %s52_s1, 4  ;;  %s11_s8 = int_to_ptr.hbm [resolvable:$true] %s10_s8  ;;  %s13_s11 = int_to_ptr.hbm [resolvable:$true] %s12_s11 }
   0x2   :  { %s34_s14 = smov 0  }
   0x3   :  { %16 = dma.general %s11_s8, 128, %s13_s11, %s32_s12, %s33_s13, [#allocation4], %s34_s14, 0  }
   0x4   :  { %30 = dma.done.wait [#allocation2], 128 }
   0x5   :  { %31 = vsyncadd [#allocation2], 4294967168 }
   0x6   :  { %20 = vsyncmov [#allocation2] }
   0x9   :  { %s21_s15 = vpop.sfrf %20 }
   0xa   :  { %p26_p0 = scmp.ne.s32.totalorder %s21_s15, 0 }
   0xc   :  { %25 = shalt.err (%p26_p0)  }

</bundles_post_ra>
